<compile_context>
chip_gen: v7x
topology: tpu7x:2x2x1
jax: 0.10.0
libtpu: 0.0.40
codegen_flags: <defaults>
</compile_context>

<pallas_src>
import functools

import jax
import jax.numpy as jnp
import numpy as np
from jax.experimental import pallas as pl
from jax.experimental.pallas import tpu as pltpu

GUIDANCE_SCALE = 7.5          # cfg.guidance_scale
LOGIT_SCALE_INIT = 2.6592     # cfg.logit_scale_init_value (unused in forward())

# Target per-input-buffer VMEM footprint for a pooling tile (~2.5 MiB). With the
# default double buffering plus the (C, TILE_S) accumulator, each pooling pass
# stays under ~8 MiB of VMEM — inside the scoped defaults on v5e (16 MiB) and
# v6e/v7x (32 MiB), and far inside v7x's 64 MiB physical VMEM.
_TARGET_TILE_BYTES = 2_621_440  # 2.5 MiB


# ----------------------------------------------------------------------------
# Stage pooling: AdaptiveAvgPool2d((1,1)) over flattened spatial, tiled.
# ----------------------------------------------------------------------------
def _pool_sum_kernel(f_ref, out_ref, acc_ref, *, inv_s):
    """Spatial mean pool for one (batch element, stage).

    f_ref  : (1, C, TILE_S) spatial chunk of one batch element
    out_ref: (1, C, 1)      pooled mean, written only on the last spatial step
    acc_ref: (C, TILE_S)    raw elementwise partial sums (VPU adds, no per-step XLU)
    """
    s = pl.program_id(1)

    @pl.when(s == 0)
    def _init():
        acc_ref[...] = jnp.zeros_like(acc_ref)

    # Steady state: pure vld + vadd (reduction deferred to the epilogue).
    acc_ref[...] += f_ref[0].astype(jnp.float32)

    @pl.when(s == pl.num_programs(1) - 1)
    def _finalize():
        # Single cross-lane reduce + divide by the *true* spatial size.
        out_ref[0] = (jnp.sum(acc_ref[...], axis=-1, keepdims=True)
                      * inv_s).astype(out_ref.dtype)


def _pick_spatial_tile(c, s, max_tile_lanes=None):
    """Choose a 128-lane-multiple spatial tile (or the full extent if small)."""
    if max_tile_lanes is None:
        max_tile_lanes = min(4096, max(128, _TARGET_TILE_BYTES // (c * 4)))
    if s <= max_tile_lanes:
        return s, s                      # single step, full extent (always legal)
    tile = max(128, (max_tile_lanes // 128) * 128)
    s_pad = pl.cdiv(s, tile) * tile
    return tile, s_pad


def pool_stage_pallas(f, max_tile_lanes=None):
    """(B, C, S) UNet feature map -> (B, C) spatial means."""
    B, C, S = f.shape
    tile, s_pad = _pick_spatial_tile(C, S, max_tile_lanes)
    if s_pad != S:
        # Zero padding does not change the accumulated sum; we divide by the true S.
        f = jnp.pad(f, ((0, 0), (0, 0), (0, s_pad - S)))
    n_s = s_pad // tile

    kernel = functools.partial(_pool_sum_kernel, inv_s=1.0 / float(S))
    pooled = pl.pallas_call(
        kernel,
        out_shape=jax.ShapeDtypeStruct((B, C, 1), jnp.float32),
        grid_spec=pltpu.PrefetchScalarGridSpec(
            num_scalar_prefetch=0,
            grid=(B, n_s),
            in_specs=[pl.BlockSpec((1, C, tile), lambda b, s: (b, 0, s))],
            out_specs=pl.BlockSpec((1, C, 1), lambda b, s: (b, 0, 0)),
            scratch_shapes=[pltpu.VMEM((C, tile), jnp.float32)],
        ),
        # batch axis "parallel" (shards across v7x's 2 TensorCores; free elsewhere),
        # spatial axis "arbitrary" (output-resident reduction).
        compiler_params=pltpu.CompilerParams(
            dimension_semantics=("parallel", "arbitrary")),
        cost_estimate=pl.CostEstimate(
            flops=B * C * s_pad,
            transcendentals=0,
            bytes_accessed=B * C * s_pad * f.dtype.itemsize + B * C * 4),
    )(f)
    return pooled[..., 0]                # (B, C)


# ----------------------------------------------------------------------------
# Epilogue: CFG combine + visual_projection (Linear, bias=False).
# ----------------------------------------------------------------------------
def _cfg_project_kernel(p1_ref, p2_ref, p3_ref, pm_ref,
                        w1_ref, w2_ref, w3_ref, w4_ref, out_ref,
                        *, nb, guidance_scale):
    """p*_ref: (B, C_i) pooled means, B = 2*nb ([text half | ucond half]).
    w*_ref : (C_i, P) per-segment slices of the transposed Linear weight.
    out_ref: (nb, P)  image_features.
    """
    p1_t = p1_ref[...][:nb]
    p2_t = p2_ref[...][:nb]
    p3_t = p3_ref[...][:nb]
    pm = pm_ref[...]
    pm_t = pm[:nb]
    pm_u = pm[nb:]
    # do_classifier_free_guidance=True, multi_scale_cfg=False:
    #   stages 1-3 keep the text-conditioned half; mid gets the CFG combine.
    pm_cfg = pm_u + guidance_scale * (pm_t - pm_u)

    # concat([p1,p2,p3,pm]) @ W^T  ==  sum of per-segment matmuls (f32 accumulate);
    # avoids a non-128-aligned in-kernel concatenate and ragged-K relayouts.
    acc = jnp.dot(p1_t, w1_ref[...], preferred_element_type=jnp.float32)
    acc = acc + jnp.dot(p2_t, w2_ref[...], preferred_element_type=jnp.float32)
    acc = acc + jnp.dot(p3_t, w3_ref[...], preferred_element_type=jnp.float32)
    acc = acc + jnp.dot(pm_cfg, w4_ref[...], preferred_element_type=jnp.float32)
    out_ref[...] = acc.astype(out_ref.dtype)


def image_features_pallas(f1, f2, f3, mid, w_proj_t, *, max_tile_lanes=None):
    """Full get_image_features hot path (pooling passes + CFG/projection epilogue)."""
    B = f1.shape[0]
    nb = B // 2
    C1, C2, C3, C4 = f1.shape[1], f2.shape[1], f3.shape[1], mid.shape[1]
    P = w_proj_t.shape[1]
    c_total = C1 + C2 + C3 + C4

    # One gridded pooling pass per stage (each is purely HBM-bandwidth-bound).
    p1 = pool_stage_pallas(f1, max_tile_lanes)
    p2 = pool_stage_pallas(f2, max_tile_lanes)
    p3 = pool_stage_pallas(f3, max_tile_lanes)
    pm = pool_stage_pallas(mid, max_tile_lanes)

    # Split the transposed weight into per-stage segments (cheap one-time XLA slices).
    w1 = w_proj_t[:C1]
    w2 = w_proj_t[C1:C1 + C2]
    w3 = w_proj_t[C1 + C2:C1 + C2 + C3]
    w4 = w_proj_t[C1 + C2 + C3:]

    vmem = pl.BlockSpec(memory_space=pltpu.MemorySpace.VMEM)
    kernel = functools.partial(_cfg_project_kernel, nb=nb,
                               guidance_scale=GUIDANCE_SCALE)
    return pl.pallas_call(
        kernel,
        out_shape=jax.ShapeDtypeStruct((nb, P), jnp.float32),
        in_specs=[vmem] * 8,
        out_specs=vmem,
        cost_estimate=pl.CostEstimate(
            flops=2 * nb * c_total * P,
            transcendentals=0,
            bytes_accessed=(c_total * P + B * c_total + nb * P) * 4),
    )(p1, p2, p3, pm, w1, w2, w3, w4)


# ----------------------------------------------------------------------------
# Reference + forward glue
# ----------------------------------------------------------------------------
def image_features_reference(f1, f2, f3, mid, w_proj_t):
    """Pure-JAX reference mirroring the PyTorch get_image_features semantics."""
    B = f1.shape[0]
    nb = B // 2
    p1 = jnp.mean(f1, axis=-1)
    p2 = jnp.mean(f2, axis=-1)
    p3 = jnp.mean(f3, axis=-1)
    pm = jnp.mean(mid, axis=-1)
    pm_cfg = pm[nb:] + GUIDANCE_SCALE * (pm[:nb] - pm[nb:])
    concat = jnp.concatenate([p1[:nb], p2[:nb], p3[:nb], pm_cfg], axis=-1)
    return concat @ w_proj_t


def forward(pooled_output_2, f1, f2, f3, mid, w_proj_t, n_p, *, max_tile_lanes=None):
    """SDXLBasePreferenceModel.forward -> (text_features, image_features).

    text_features: with CFG, pooled CLIP-2 output chunk(2)[0] (text half). Glue only.
    image_features: Pallas kernels above.
    """
    text_features = pooled_output_2[:n_p]
    img_features = image_features_pallas(f1, f2, f3, mid, w_proj_t,
                                         max_tile_lanes=max_tile_lanes)
    return text_features, img_features


if __name__ == "__main__":
    key = jax.random.PRNGKey(0)
    k1, k2, k3, k4, k5, k6 = jax.random.split(key, 6)

    # Small synthetic shapes (real SDXL: C = 320/640/1280/1280, concat=3520, proj=1280,
    # spatial = 16384/4096/1024/1024).
    n_p = 2                 # prompts
    n_i = 2                 # images (n_i == n_p path)
    B = 2 * n_i             # UNet batch after CFG doubling: [text half | ucond half]
    C1, C2, C3, C4 = 64, 128, 256, 256
    H1, H2, H3, H4 = 20, 8, 4, 4      # H1=20 -> S=400 exercises the ragged/pad path
    C_TOTAL = C1 + C2 + C3 + C4
    PROJ_DIM = 256

    # Synthetic UNet outputs, NCHW flattened to (B, C, H*W)  # layout: see header
    f1 = jax.random.normal(k1, (B, C1, H1 * H1), jnp.float32)   # down_block_res_samples[2]
    f2 = jax.random.normal(k2, (B, C2, H2 * H2), jnp.float32)   # down_block_res_samples[5]
    f3 = jax.random.normal(k3, (B, C3, H3 * H3), jnp.float32)   # down_block_res_samples[8]
    mid = jax.random.normal(k4, (B, C4, H4 * H4), jnp.float32)  # mid_output

    # Synthetic pooled output of text_encoder_2 (text half + ucond half)
    pooled_output_2 = jax.random.normal(k5, (2 * n_p, PROJ_DIM), jnp.float32)

    # visual_projection: nn.Linear(C_TOTAL, PROJ_DIM, bias=False), init normal std=0.02.
    # Stored transposed (in_features, out_features) so y = x @ W^T.
    w_proj_t = 0.02 * jax.random.normal(k6, (C_TOTAL, PROJ_DIM), jnp.float32)

    # logit_scale parameter exists on the module but is not used in forward()
    logit_scale = jnp.array(LOGIT_SCALE_INIT, jnp.float32)
    del logit_scale

    # max_tile_lanes=128 forces the multi-step accumulator + zero-padded-tail path
    # at these toy sizes (f1: S=400 -> 4 tiles of 128); at real shapes the default
    # tile picker selects ~2048/512-lane tiles automatically.
    text_features, img_features = forward(
        pooled_output_2, f1, f2, f3, mid, w_proj_t, n_p, max_tile_lanes=128)
    jax.block_until_ready(img_features)

    ref = image_features_reference(f1, f2, f3, mid, w_proj_t)
    np.testing.assert_allclose(np.asarray(img_features), np.asarray(ref),
                               rtol=1e-4, atol=1e-4)
    assert text_features.shape == (n_p, PROJ_DIM)
    assert img_features.shape == (n_i, PROJ_DIM)

    print("KERNEL_OK")
</pallas_src>

<mosaic_0001>
module attributes {stable_mosaic.version = 11 : i64} {
  func.func @_pool_sum_kernel(%arg0: i32, %arg1: i32, %arg2: memref<1x64x128xf32, #tpu.memory_space<vmem>>, %arg3: memref<1x64x1xf32, #tpu.memory_space<vmem>>, %arg4: memref<64x128xf32, #tpu.memory_space<vmem>>) attributes {dimension_semantics = [#tpu.dimension_semantics<parallel>, #tpu.dimension_semantics<arbitrary>], iteration_bounds = array<i64: 4, 4>, scalar_prefetch = 0 : i64, scratch_operands = 1 : i64, tpu.core_type = #tpu.core_type<tc>, window_params = [{transform_indices = @transform_0, window_bounds = array<i64: 1, 64, 128>}, {transform_indices = @transform_1, window_bounds = array<i64: 1, 64, 1>}]} {
    %c0_i32 = arith.constant 0 : i32
    %0 = arith.cmpi eq, %arg1, %c0_i32 : i32
    %1 = arith.extui %0 : i1 to i32
    %c0_i32_0 = arith.constant 0 : i32
    %2 = arith.cmpi ne, %1, %c0_i32_0 : i32
    scf.if %2 {
      %cst = arith.constant 0.000000e+00 : f32
      %11 = vector.broadcast %cst : f32 to vector<64x128xf32>
      %c0_8 = arith.constant 0 : index
      %c0_9 = arith.constant 0 : index
      %12 = vector.load %arg4[%c0_8, %c0_9] : memref<64x128xf32, #tpu.memory_space<vmem>>, vector<64x128xf32>
      tpu.vector_store %arg4[%c0_8, %c0_9], %11 {strides = array<i32>} : memref<64x128xf32, #tpu.memory_space<vmem>>, vector<64x128xf32>,
    } else {
    }
    %c0 = arith.constant 0 : index
    %c0_1 = arith.constant 0 : index
    %3 = vector.load %arg4[%c0, %c0_1] : memref<64x128xf32, #tpu.memory_space<vmem>>, vector<64x128xf32>
    %c0_2 = arith.constant 0 : index
    %c0_3 = arith.constant 0 : index
    %c0_4 = arith.constant 0 : index
    %4 = vector.load %arg2[%c0_2, %c0_3, %c0_4] : memref<1x64x128xf32, #tpu.memory_space<vmem>>, vector<1x64x128xf32>
    %5 = vector.shape_cast %4 : vector<1x64x128xf32> to vector<64x128xf32>
    %6 = arith.addf %3, %5 : vector<64x128xf32>
    %c0_5 = arith.constant 0 : index
    %c0_6 = arith.constant 0 : index
    %7 = vector.load %arg4[%c0_5, %c0_6] : memref<64x128xf32, #tpu.memory_space<vmem>>, vector<64x128xf32>
    tpu.vector_store %arg4[%c0_5, %c0_6], %6 {strides = array<i32>} : memref<64x128xf32, #tpu.memory_space<vmem>>, vector<64x128xf32>,
    %c3_i32 = arith.constant 3 : i32
    %8 = arith.cmpi eq, %arg1, %c3_i32 : i32
    %9 = arith.extui %8 : i1 to i32
    %c0_i32_7 = arith.constant 0 : i32
    %10 = arith.cmpi ne, %9, %c0_i32_7 : i32
    scf.if %10 {
      %c0_8 = arith.constant 0 : index
      %c0_9 = arith.constant 0 : index
      %11 = vector.load %arg4[%c0_8, %c0_9] : memref<64x128xf32, #tpu.memory_space<vmem>>, vector<64x128xf32>
      %cst = arith.constant dense<0.000000e+00> : vector<64xf32>
      %12 = vector.multi_reduction <add>, %11, %cst [1] : vector<64x128xf32> to vector<64xf32>
      %13 = vector.shape_cast %12 : vector<64xf32> to vector<64x1xf32>
      %cst_10 = arith.constant 2.500000e-03 : f32
      %14 = vector.broadcast %cst_10 : f32 to vector<64x1xf32>
      %15 = arith.mulf %13, %14 : vector<64x1xf32>
      %c0_11 = arith.constant 0 : index
      %c0_12 = arith.constant 0 : index
      %c0_13 = arith.constant 0 : index
      %16 = vector.load %arg3[%c0_11, %c0_12, %c0_13] : memref<1x64x1xf32, #tpu.memory_space<vmem>>, vector<1x64x1xf32>
      %17 = vector.shape_cast %16 : vector<1x64x1xf32> to vector<64x1xf32>
      %18 = vector.shape_cast %15 : vector<64x1xf32> to vector<1x64x1xf32>
      tpu.vector_store %arg3[%c0_11, %c0_12, %c0_13], %18 {strides = array<i32>} : memref<1x64x1xf32, #tpu.memory_space<vmem>>, vector<1x64x1xf32>,
    } else {
    }
    return
  }
  func.func @transform_0(%arg0: i32, %arg1: i32) -> (i32, i32, i32) {
    %c0_i32 = arith.constant 0 : i32
    %c0_i32_0 = arith.constant 0 : i32
    return %arg0, %c0_i32, %arg1 : i32, i32, i32
  }
  func.func @transform_1(%arg0: i32, %arg1: i32) -> (i32, i32, i32) {
    %c0_i32 = arith.constant 0 : i32
    %c0_i32_0 = arith.constant 0 : i32
    %c0_i32_1 = arith.constant 0 : i32
    return %arg0, %c0_i32, %c0_i32_0 : i32, i32, i32
  }
}

</mosaic_0001>

<bundles_post_ra>
// kernel: tpu_custom_call.1
= control target key start
LH: loop header
LB: loop body
LE: loop exit
PB: predicated region body
PF: predicated region fallthrough
CT: control target
= control target key end

     0   :  { %6 = vsyncpa [#allocation4], 0  ;;  %s706_s0 = inlined_call_operand.hbm [shape: f32[4,64,512], index: 0, kind: input, shape index: {}]   ;;  %s707_s1 = inlined_call_operand.vmem [shape: f32[4,64,1], index: 1, kind: output, shape index: {}]  }
   0x1   :  { %8 = vsyncpa [#allocation4 + $0x1], 0  ;;  %s525_s6 = smov 0   ;;  %s527_s7 = smov 0  }
   0x2   :  { %s529_s8 = smov 0   ;;  %s531_s9 = smov 0  }
   0x3   :  { %s533_s10 = smov 0   ;;  %s535_s11 = smov 0  }
   0x4   :  { %s537_s12 = smov 0   ;;  %s539_s13 = smov 0  }
   0x5 LB: > { %s321_s14 = sadd.s32 4294967295, %s508_s13   ;;  %s23_s15 = sadd.s32 1, %s500_s11  ;;  %s508_s13 = sphi %s539_s13, %s14_s13   ;;  %s504_s12 = sphi %s537_s12, %s718_s12   ;;  %s500_s11 = sphi %s535_s11, %s717_s11   ;;  %s496_s10 = sphi %s533_s10, %s716_s10   ;;  %s492_s9 = sphi %s531_s9, %s715_s9   ;;  %s488_s8 = sphi %s529_s8, %s714_s8   ;;  %s484_s7 = sphi %s527_s7, %s713_s7   ;;  %s480_s6 = sphi %s525_s6, %s712_s6  }
   0x6   : > { %p24_p0 = scmp.ge.s32.totalorder %s23_s15, 4  ;;  %s26_s16 = sadd.s32 1, %s504_s12 }
   0x7   : > { %s35_s17 = sadd.s32 1, %s488_s8  ;;  %p42_p1 = scmp.ne.s32.totalorder %s488_s8, %s484_s7 }
   0x8   : > { %s720_s15 = smov (%p24_p0, %s23_s15), 0  ;;  %s722_s16 = smov (!%p24_p0, %s26_s16), %s504_s12 }
   0x9   : > { %s31_s18 = ssub.s32 %s500_s11, %s720_s15  ;;  %p43_p2 = scmp.eq.s32.totalorder %s508_s13, 0 }
   0xa   : > { %p28_p3 = scmp.ge.s32.totalorder %s722_s16, 4  ;;  %p48_p4 = scmp.ne.s32.totalorder %s484_s7, %s480_s6 }
   0xb   : > { %p576_p5 = por %p43_p2, %p42_p1  ;;  %p49_p6 = scmp.eq.s32.totalorder %s321_s14, 0 }
   0xc   : > { %s724_s16 = smov (%p28_p3, %s722_s16), 0  ;;  %p343_p8 = scmp.lt.s32.totalorder %s508_s13, 16 }
   0xd   : > { %p582_p7 = por %p49_p6, %p48_p4  ;;  %s30_s21 = ssub.s32 %s504_s12, %s724_s16 }
   0xe   : > { %s32_s22 = sor.u32 %s31_s18, %s30_s21  ;;  %s98_s23 = sand.u32 1, %s488_s8  }
   0xf   : > { %p33_p9 = scmp.eq.s32.totalorder %s32_s22, 0  ;;  %s325_s24 = sshll.u32 %s98_s23, 6 }
  0x10   : > { %s326_s25 = sshll.u32 %s504_s12, 5  ;;  %s102_s29 = scalar_lea.vmem [#allocation3], %s325_s24 }
  0x11   : > { %s592_s26 = scalar_select %p33_p9, %s488_s8, %s35_s17  }
  0x12   : > { %s107_s27 = sadd.s32 %s500_s11, %s326_s25  ;;  %s110_s30 = sshll.u32 %s102_s29, 4  ;;  %s600_s30 = int_to_ptr.vmem [resolvable:$true] %s110_s30 }
  0x13   : > { %s327_s28 = sshll.u32 %s107_s27, 7  ;;  %p606_p10 = pnand %p343_p8, %p576_p5 }
  0x14   : > { %s598_s4 = scalar_lea.hbm %s706_s0, %s327_s28  ;;  %s611_s6 = scalar_lea.sflag [#allocation4], %s98_s23 }
  0x15   : > { %s412_s14 = scalar_lea.hbm %s598_s4, 1024  ;;  %p414_p13 = pneg %p606_p10 }
  0x16   : > { %p413_p12 = scmp.ne.s32.totalorder %s598_s4, %s412_s14  ;;  %s417_s19 = scalar_lea.hbm %s706_s0, 16384 }
  0x17   : > { %p418_p2 = scmp.lt.u32.totalorder %s598_s4, %s706_s0  ;;  %p419_p3 = scmp.lt.u32.totalorder %s417_s19, %s412_s14 }
  0x18   : > { %p415_p0 = pnand %p414_p13, %p413_p12  ;;  %p421_p5 = scmp.lt.u32.totalorder %s412_s14, %s598_s4 }
  0x19   : > { %p420_p4 = por %p419_p3, %p418_p2 }
  0x1a   : > { %p416_p1 = pneg %p415_p0 }
  0x1b   : > { %p422_p6 = por %p421_p5, %p420_p4 }
  0x1d   : > { %p423_p8 = pnand %p422_p6, %p416_p1 }
  0x1f   : > { %426 = shalt.err (!%p423_p8)
}
  0x20   : > { %s427_s23 = scalar_lea.vmem %s600_s30, 1024  ;;  %s510_s24 = smov [#allocation3]  }
  0x21   : > { %p428_p9 = scmp.ne.s32.totalorder %s600_s30, %s427_s23  ;;  %s432_s25 = sshll.u32 %s510_s24, 4  ;;  %s433_s25 = int_to_ptr.vmem [resolvable:$false] %s432_s25 }
  0x22   : > { %s434_s27 = scalar_lea.vmem %s433_s25, 2048  ;;  %p435_p11 = scmp.lt.s32.totalorder %s600_s30, %s433_s25 }
  0x23   : > { %p430_p12 = pnand %p428_p9, %p414_p13  ;;  %p436_p2 = scmp.lt.s32.totalorder %s434_s27, %s427_s23 }
  0x25   : > { %p431_p0 = pneg %p430_p12  ;;  %p437_p3 = por %p436_p2, %p435_p11 }
  0x27   : > { %p438_p4 = pnand %p437_p3, %p431_p0 }
  0x29   : > { %441 = shalt.err (!%p438_p4)
}
  0x2a   : > { %s511_s28 = smov 512   ;;  %s512_s29 = smov 128  }
  0x2b   : > { %s513_s2 = smov 8   ;;  %p118_p13 = scmp.lt.s32.totalorder %s508_s13, 17 }
  0x2c   : > { %342 = dma.hbm_to_vmem [thread:$0]  (!%p606_p10), %s598_s4, 1024, %s600_s30, %s611_s6, %s511_s28, %s512_s29, %s513_s2  }
  0x2d   : > { %p711_p1 = scmp.ge.s32.totalorder %s508_s13, 1 }
  0x2f   : > { %p119_p5 = pnand %p711_p1, %p118_p13 }
  0x30   : > { %s124_s3 = sand.u32 (!%p119_p5), 1, %s484_s7  }
  0x31   : > { %122 = sbr.rel (%p119_p5) target bundleno = 236 (0xec), region = 24  ;;  %s329_s14 = sshll.u32 (!%p119_p5), %s124_s3, 6 }
  0x32   : > { %s125_s17 = scalar_lea.sflag (!%p119_p5), [#allocation4], %s124_s3  ;;  %s643_s18 = scalar_lea.vmem (!%p119_p5), [#allocation3], %s329_s14 }
  0x38   : > { %475 = dma.done.wait (%p582_p7), %s125_s17, 1024  }
  0x39   : > { %477 = vsyncadd (%p582_p7), %s125_s17, 4294966272  ;;  %p147_p11 = scmp.lt.s32.totalorder %s496_s10, 3  ;;  %p332_p10 = scmp.ne.s32.totalorder %s492_s9, 0 }
  0x3a   : > { %v514_v0 = vmov (!%p332_p10), 0.0  }
  0x3b   : > { %s726_s10 = smov (!%p147_p11, %s496_s10), 3  ;;  %155 = sbr.rel (%p332_p10) target bundleno = 66 (0x42), region = 32 }
  0x3c   : > { %s336_s30 = sshll.u32 %s726_s10, 6  ;;  %156 = vst [vmem:[#allocation2] sm:$0xff] (!%p332_p10), %v514_v0  ;;  %157 = vst [vmem:[#allocation2 + $0x8] sm:$0xff] (!%p332_p10), %v514_v0 }
  0x3d   : > { %s654_s6 = scalar_lea.vmem %s707_s1, %s336_s30  ;;  %158 = vst [vmem:[#allocation2 + $0x10] sm:$0xff] (!%p332_p10), %v514_v0  ;;  %159 = vst [vmem:[#allocation2 + $0x18] sm:$0xff] (!%p332_p10), %v514_v0 }
  0x3e   : > { %160 = vst [vmem:[#allocation2 + $0x20] sm:$0xff] (!%p332_p10), %v514_v0  ;;  %161 = vst [vmem:[#allocation2 + $0x28] sm:$0xff] (!%p332_p10), %v514_v0 }
  0x3f   : > { %162 = vst [vmem:[#allocation2 + $0x30] sm:$0xff] (!%p332_p10), %v514_v0  ;;  %163 = vst [vmem:[#allocation2 + $0x38] sm:$0xff] (!%p332_p10), %v514_v0 }
  0x42 PF: > { %v172_v2 = vld [vmem:[%s643_s18] sm:$0xff]  ;;  %v173_v5 = vld [vmem:[%s643_s18 + $0x8] sm:$0xff]  ;;  %v174_v7 = vld [vmem:[%s643_s18 + $0x10] sm:$0xff]  ;;  %p333_p7 = scmp.ne.s32.totalorder %s492_s9, 3 }
  0x43   : > { %v164_v1 = vld [vmem:[#allocation2] sm:$0xff]  ;;  %v165_v3 = vld [vmem:[#allocation2 + $0x8] sm:$0xff]  ;;  %v175_v11 = vld [vmem:[%s643_s18 + $0x18] sm:$0xff]  ;;  %vm232_vm0 = vcmask (!%p333_p7), 7168  }
  0x44   : > { %v180_v4 = vadd.f32 %v172_v2, %v164_v1  ;;  %v166_v6 = vld [vmem:[#allocation2 + $0x10] sm:$0xff]  ;;  %v181_v8 = vadd.f32 %v173_v5, %v165_v3  ;;  %v167_v10 = vld [vmem:[#allocation2 + $0x18] sm:$0xff]  ;;  %v176_v14 = vld [vmem:[%s643_s18 + $0x20] sm:$0xff] }
  0x45   : > { %v182_v9 = vadd.f32 %v174_v7, %v166_v6  ;;  %v168_v12 = vld [vmem:[#allocation2 + $0x20] sm:$0xff]  ;;  %v183_v13 = vadd.f32 %v175_v11, %v167_v10  ;;  %v169_v15 = vld [vmem:[#allocation2 + $0x28] sm:$0xff]  ;;  %v178_v20 = vld [vmem:[%s643_s18 + $0x30] sm:$0xff]  ;;  %199 = sbr.rel (%p333_p7) target bundleno = 236 (0xec), region = 36 }
  0x46   : > { %188 = vst [vmem:[#allocation2] sm:$0xff] %v180_v4  ;;  %v177_v16 = vld [vmem:[%s643_s18 + $0x28] sm:$0xff]  ;;  %189 = vst [vmem:[#allocation2 + $0x8] sm:$0xff] %v181_v8  ;;  %v184_v17 = vadd.f32 %v176_v14, %v168_v12  ;;  %v170_v19 = vld [vmem:[#allocation2 + $0x30] sm:$0xff] }
  0x47   : > { %190 = vst [vmem:[#allocation2 + $0x10] sm:$0xff] %v182_v9  ;;  %v185_v18 = vadd.f32 %v177_v16, %v169_v15  ;;  %v171_v21 = vld [vmem:[#allocation2 + $0x38] sm:$0xff]  ;;  %191 = vst [vmem:[#allocation2 + $0x18] sm:$0xff] %v183_v13  ;;  %v186_v22 = vadd.f32 %v178_v20, %v170_v19 }
  0x48   : > { %v179_v23 = vld [vmem:[%s643_s18 + $0x38] sm:$0xff]  ;;  %192 = vst [vmem:[#allocation2 + $0x20] sm:$0xff] %v184_v17 }
  0x49   : > { %193 = vst [vmem:[#allocation2 + $0x28] sm:$0xff] %v185_v18  ;;  %v187_v24 = vadd.f32 %v179_v23, %v171_v21  ;;  %194 = vst [vmem:[#allocation2 + $0x30] sm:$0xff] %v186_v22 }
  0x4b   : > { %195 = vst [vmem:[#allocation2 + $0x38] sm:$0xff] %v187_v24 }
  0x4d   : > { %v200_v26 = vld [vmem:[#allocation2] sm:$0xff]  ;;  %v201_v28 = vld [vmem:[#allocation2 + $0x8] sm:$0xff] }
  0x4e   : > { %v202_v25 = vld [vmem:[#allocation2 + $0x10] sm:$0xff]  ;;  %208 = vadd.xlane.f32.xlu0 %v200_v26  ;;  %v203_v27 = vld [vmem:[#allocation2 + $0x18] sm:$0xff] }
  0x4f   : > { %212 = vadd.xlane.f32.xlu1 %v202_v25  ;;  %v204_v30 = vld [vmem:[#allocation2 + $0x20] sm:$0xff] }
  0x50   : > { %v205_v29 = vld [vmem:[#allocation2 + $0x28] sm:$0xff]  ;;  %v206_v32 = vld [vmem:[#allocation2 + $0x30] sm:$0xff] }
  0x52   : > { %210 = vadd.xlane.f32.xlu0 %v201_v28  ;;  %v207_v31 = vld [vmem:[#allocation2 + $0x38] sm:$0xff] }
  0x53   : > { %214 = vadd.xlane.f32.xlu1 %v203_v27 }
  0x56   : > { %216 = vadd.xlane.f32.xlu0 %v204_v30 }
  0x57   : > { %218 = vadd.xlane.f32.xlu1 %v205_v29 }
  0x5a   : > { %220 = vadd.xlane.f32.xlu0 %v206_v32 }
  0x5b   : > { %222 = vadd.xlane.f32.xlu1 %v207_v31 }
  0xdb   : > { %v209_v34 = vpop.xlane.xlu0 %208 }
  0xdc   : > { %v213_v33 = vpop.xlane.xlu1 %212  ;;  %v224_v36 = vmul.f32 0.0025, %v209_v34 }
  0xdd   : > { %v226_v35 = vmul.f32 0.0025, %v213_v33 }
  0xde   : > { %233 = vst.msk [vmem:[%s654_s6] sm:$0xff] %vm232_vm0, %v224_v36 }
  0xdf   : > { %235 = vst.msk [vmem:[%s654_s6 + $0x10] sm:$0xff] %vm232_vm0, %v226_v35  ;;  %v211_v38 = vpop.xlane.xlu0 %210 }
  0xe0   : > { %v215_v37 = vpop.xlane.xlu1 %214  ;;  %v225_v40 = vmul.f32 0.0025, %v211_v38 }
  0xe1   : > { %v227_v39 = vmul.f32 0.0025, %v215_v37 }
  0xe2   : > { %234 = vst.msk [vmem:[%s654_s6 + $0x8] sm:$0xff] %vm232_vm0, %v225_v40 }
  0xe3   : > { %236 = vst.msk [vmem:[%s654_s6 + $0x18] sm:$0xff] %vm232_vm0, %v227_v39  ;;  %v217_v42 = vpop.xlane.xlu0 %216 }
  0xe4   : > { %v219_v41 = vpop.xlane.xlu1 %218  ;;  %v228_v44 = vmul.f32 0.0025, %v217_v42 }
  0xe5   : > { %v229_v43 = vmul.f32 0.0025, %v219_v41 }
  0xe6   : > { %237 = vst.msk [vmem:[%s654_s6 + $0x20] sm:$0xff] %vm232_vm0, %v228_v44 }
  0xe7   : > { %238 = vst.msk [vmem:[%s654_s6 + $0x28] sm:$0xff] %vm232_vm0, %v229_v43  ;;  %v221_v46 = vpop.xlane.xlu0 %220 }
  0xe8   : > { %v223_v45 = vpop.xlane.xlu1 %222  ;;  %v230_v48 = vmul.f32 0.0025, %v221_v46 }
  0xe9   : > { %v231_v47 = vmul.f32 0.0025, %v223_v45 }
  0xea   : > { %239 = vst.msk [vmem:[%s654_s6 + $0x30] sm:$0xff] %vm232_vm0, %v230_v48 }
  0xeb   : > { %240 = vst.msk [vmem:[%s654_s6 + $0x38] sm:$0xff] %vm232_vm0, %v231_v47 }
  0xec PF: > { %s14_s13 = sadd.s32 1, %s508_s13   ;;  %s712_s6 = smov %s484_s7 }
  0xed   : > { %p11_p6 = scmp.ge.s32.totalorder %s14_s13, 18   ;;  %s713_s7 = smov %s488_s8 }
  0xee   : > { %s714_s8 = smov %s592_s26  ;;  %s715_s9 = smov %s500_s11 }
  0xef   : > { %s716_s10 = smov %s504_s12  ;;  %s717_s11 = smov %s720_s15 }
  0xf0   : > { %s718_s12 = smov %s724_s16  ;;  %13 = sbr.rel (!%p11_p6) target bundleno = 5 (0x5), region = 72 }
  0xf7   :  { %262 = vsyncpa [#allocation4], 1 }
  0xf8   :  { %264 = vsyncpa [#allocation4 + $0x1], 1 }

</bundles_post_ra>
